<compile_context>
chip_gen: v6e
topology: v6e:2x2x1
jax: 0.10.0
libtpu: 0.0.40
codegen_flags: <defaults>
</compile_context>

<pallas_src>
import functools

import jax
import jax.numpy as jnp
from jax import lax
from jax.experimental import pallas as pl
from jax.experimental.pallas import tpu as pltpu

_NEG_INF = float("-inf")


def _cdiv(a, b):
    return -(-a // b)


def _round_up(x, m):
    return ((x + m - 1) // m) * m


def _vmem_capacity_bytes():
    try:
        info = pltpu.get_tpu_info()
        cap = getattr(info, "vmem_capacity_bytes", None)
        if cap:
            return int(cap)
    except Exception:
        pass
    return 64 * 1024 * 1024  # conservative default (v7x per-TensorCore VMEM)


def _maxpool_agg_kernel(lens_ref, x_ref, o_ref, acc_ref, *, b_chunk, s_chunk):
    """Masked running max over the sentence axis.

    lens_ref: VMEM i32[TB, 1]      valid-sentence count per batch row
    x_ref:    VMEM f32[TB, BS, H]  one (batch-tile, S-chunk) slab of embeddings
    o_ref:    VMEM f32[TB, H]      pooled output tile (resident across k)
    acc_ref:  VMEM f32[TB, H]      running-max scratch (persists across k)
    """
    k = pl.program_id(1)
    n_k = pl.num_programs(1)
    TB, BS, H = x_ref.shape

    @pl.when(k == 0)
    def _init():
        acc_ref[...] = jnp.full_like(acc_ref, _NEG_INF)

    base = k * BS                      # element offset of this S-chunk in S
    is_last = k == n_k - 1

    nb = TB // b_chunk                 # TB is always a multiple of b_chunk (8)
    ns_full = BS // s_chunk
    s_rem = BS - ns_full * s_chunk

    # Hoisted iotas (JAX does not CSE broadcast_in_dim; keep out of loops).
    iota_full = (lax.broadcasted_iota(jnp.int32, (1, s_chunk, 1), 1)
                 if ns_full > 0 else None)
    iota_rem = (lax.broadcasted_iota(jnp.int32, (1, s_rem, 1), 1)
                if s_rem > 0 else None)

    def b_body(bi, carry):
        bstart = pl.multiple_of(bi * b_chunk, b_chunk)
        lens_c = lens_ref[pl.ds(bstart, b_chunk), :]            # (b_chunk, 1)
        lens3 = lens_c[:, :, None]                              # (b_chunk, 1, 1)

        def accumulate(sstart, size, iota):
            xc = x_ref[pl.ds(bstart, b_chunk), pl.ds(sstart, size), :]
            rows = base + sstart + iota                          # (1, size, 1)
            valid = rows < lens3                                 # (b_chunk, size, 1)
            masked = jnp.where(valid, xc, _NEG_INF)
            cur = acc_ref[pl.ds(bstart, b_chunk), :]
            acc_ref[pl.ds(bstart, b_chunk), :] = jnp.maximum(
                cur, jnp.max(masked, axis=1))

        if ns_full > 0:
            def s_body(si, c):
                accumulate(pl.multiple_of(si * s_chunk, s_chunk), s_chunk,
                           iota_full)
                return c
            lax.fori_loop(0, ns_full, s_body, 0)
        if s_rem > 0:
            accumulate(ns_full * s_chunk, s_rem, iota_rem)

        @pl.when(is_last)
        def _finalize():
            pooled = jnp.where(lens_c > 0,
                               acc_ref[pl.ds(bstart, b_chunk), :], 0.0)
            o_ref[pl.ds(bstart, b_chunk), :] = pooled.astype(o_ref.dtype)

        return carry

    lax.fori_loop(0, nb, b_body, 0)


def max_pool_aggregator(padded_embeddings, num_sentences, *,
                        block_b=None, block_s=None):
    """padded_embeddings: f32[B, S, H]; num_sentences: i32[B] -> f32[B, H]."""
    B, S, H = padded_embeddings.shape
    itemsize = jnp.dtype(padded_embeddings.dtype).itemsize
    vmem_cap = _vmem_capacity_bytes()

    # --- tile sizing (generation-aware) ------------------------------------
    # Per-step input slab target; Pallas double-buffers it. ~8 MiB keeps the
    # 2-deep pipeline comfortable on v7x (64 MiB physical VMEM), ~12 MiB on
    # 128-MiB-VMEM chips (v5e/v6e) — both in the HBM-roofline sweet spot.
    tile_target = (12 * 1024 * 1024 if vmem_cap >= 128 * 1024 * 1024
                   else 8 * 1024 * 1024)
    row_bytes = max(S * H * itemsize, 1)

    if block_s is None:
        if 8 * row_bytes <= tile_target:
            block_s = S                                # full S fits at TB = 8
        else:
            rows = tile_target // (8 * H * itemsize)
            block_s = max(8, (rows // 8) * 8)          # multiple of 8 sublanes
    if block_b is None:
        slab_rows = tile_target // max(block_s * H * itemsize, 1)
        block_b = max(8, (slab_rows // 8) * 8)
        block_b = min(block_b, _round_up(B, 8))
        # v7x megacore: ensure >= 2 steps on the "parallel" batch axis when
        # possible so both TensorCores get work (no-op on v5e/v6e).
        if _cdiv(B, block_b) == 1 and B > 8:
            block_b = min(_round_up(_cdiv(B, 2), 8), _round_up(B, 8))

    grid_b = _cdiv(B, block_b)
    grid_s = _cdiv(S, block_s)
    Bp = grid_b * block_b

    # In-kernel sub-chunk sizes: keep each (8, s_chunk, H) slab ~128 KiB so no
    # tile-sized masked temporary is ever live in vregs.
    b_chunk = 8
    s_chunk = max(8, ((128 * 1024) // max(b_chunk * H * itemsize, 1) // 8) * 8)
    s_chunk = min(s_chunk, block_s) if block_s >= 8 else block_s
    # TODO(synk): for extremely wide H (>= ~8K) also chunk the lane axis so one
    # (8, 8, H) slab stays within the 64-vreg budget.

    # Only the tiny 1-D length vector is padded to the grid extent; the big
    # [B, S, H] tensor is never copied. Ragged edge blocks read garbage but
    # carry lens == 0, so they pool to -inf -> 0 and their out-of-range output
    # rows are dropped by the masked writeback.
    lens = num_sentences.astype(jnp.int32)
    if Bp != B:
        lens = jnp.pad(lens, (0, Bp - B))
    lens_2d = lens.reshape(Bp, 1)

    out_itemsize = itemsize
    in_tile = block_b * block_s * H * itemsize
    out_tile = block_b * H * out_itemsize
    acc_tile = block_b * H * 4
    needed = 2 * in_tile + 2 * out_tile + acc_tile + 2 * block_b * 4
    vmem_limit = int(min(max(needed + (8 << 20), 32 << 20),
                         max(int(0.9 * vmem_cap), 32 << 20)))

    kernel = functools.partial(_maxpool_agg_kernel,
                               b_chunk=b_chunk, s_chunk=s_chunk)

    out = pl.pallas_call(
        kernel,
        out_shape=jax.ShapeDtypeStruct((B, H), padded_embeddings.dtype),
        grid_spec=pltpu.PrefetchScalarGridSpec(
            num_scalar_prefetch=0,
            grid=(grid_b, grid_s),
            in_specs=[
                pl.BlockSpec((block_b, 1), lambda b, k: (b, 0)),
                pl.BlockSpec((block_b, block_s, H), lambda b, k: (b, k, 0)),
            ],
            out_specs=pl.BlockSpec((block_b, H), lambda b, k: (b, 0)),
            scratch_shapes=[pltpu.VMEM((block_b, H), jnp.float32)],
        ),
        compiler_params=pltpu.CompilerParams(
            dimension_semantics=("parallel", "arbitrary"),
            vmem_limit_bytes=vmem_limit,
        ),
        cost_estimate=pl.CostEstimate(
            flops=int(B) * int(S) * int(H),
            transcendentals=0,
            bytes_accessed=int(B * S * H * itemsize
                               + B * H * out_itemsize + Bp * 4),
        ),
    )(lens_2d, padded_embeddings)

    return out


def pad_sequence_jax(seq_list, max_len, hidden):
    """Equivalent of torch pad_sequence(batch_first=True) for 2-D tensors."""
    out = []
    for s in seq_list:
        pad_rows = max_len - s.shape[0]
        out.append(jnp.pad(s, ((0, pad_rows), (0, 0))))
    return jnp.stack(out, axis=0)


def _reference(padded, num_sentences):
    S = padded.shape[1]
    row_ids = jnp.arange(S)[None, :, None]
    mask = row_ids < num_sentences[:, None, None]
    ref = jnp.max(jnp.where(mask, padded, -jnp.inf), axis=1)
    return jnp.where((num_sentences > 0)[:, None], ref, 0.0)


if __name__ == "__main__":
    key = jax.random.PRNGKey(0)

    # --- test 1: small shapes, includes an empty document -------------------
    B, S_MAX, H = 4, 8, 128
    lengths = [5, 8, 0, 3]
    keys = jax.random.split(key, B)
    sentence_embeddings_list = []
    for i, n in enumerate(lengths):
        if n > 0:
            emb = jax.random.normal(keys[i], (n, H), dtype=jnp.float32)
        else:
            emb = jnp.zeros((0, H), dtype=jnp.float32)
        sentence_embeddings_list.append(emb)

    padded = pad_sequence_jax(sentence_embeddings_list, S_MAX, H)   # [B, S, H]
    num_sentences = jnp.array(lengths, dtype=jnp.int32)             # [B]

    out = jax.block_until_ready(max_pool_aggregator(padded, num_sentences))
    ref = _reference(padded, num_sentences)
    assert out.shape == (B, H)
    assert jnp.allclose(out, ref, atol=1e-6), "mismatch vs reference (test 1)"

    # --- test 2: force multi-block grid (ragged batch + S accumulation) -----
    B2, S2, H2 = 12, 20, 128
    lengths2 = [20, 0, 7, 13, 1, 20, 5, 0, 19, 8, 2, 11]
    x2 = jax.random.normal(jax.random.PRNGKey(1), (B2, S2, H2), jnp.float32)
    ids2 = jnp.arange(S2)[None, :, None]
    n2 = jnp.array(lengths2, dtype=jnp.int32)
    x2 = jnp.where(ids2 < n2[:, None, None], x2, 0.0)   # zero the padding rows

    out2 = jax.block_until_ready(
        max_pool_aggregator(x2, n2, block_b=8, block_s=8))
    ref2 = _reference(x2, n2)
    assert out2.shape == (B2, H2)
    assert jnp.allclose(out2, ref2, atol=1e-6), "mismatch vs reference (test 2)"

    print("KERNEL_OK")
</pallas_src>

<mosaic_0001>
module attributes {stable_mosaic.version = 11 : i64} {
  func.func @_maxpool_agg_kernel(%arg0: i32, %arg1: i32, %arg2: memref<8x1xi32, #tpu.memory_space<vmem>>, %arg3: memref<8x8x128xf32, #tpu.memory_space<vmem>>, %arg4: memref<8x128xf32, #tpu.memory_space<vmem>>, %arg5: memref<8x128xf32, #tpu.memory_space<vmem>>) attributes {dimension_semantics = [#tpu.dimension_semantics<parallel>, #tpu.dimension_semantics<arbitrary>], iteration_bounds = array<i64: 1, 1>, scalar_prefetch = 0 : i64, scratch_operands = 1 : i64, tpu.core_type = #tpu.core_type<tc>, window_params = [{transform_indices = @transform_0, window_bounds = array<i64: 8, 1>}, {transform_indices = @transform_1, window_bounds = array<i64: 8, 8, 128>}, {transform_indices = @transform_2, window_bounds = array<i64: 8, 128>}]} {
    %c0_i32 = arith.constant 0 : i32
    %0 = arith.cmpi eq, %arg1, %c0_i32 : i32
    %1 = arith.extui %0 : i1 to i32
    %c0_i32_0 = arith.constant 0 : i32
    %2 = arith.cmpi ne, %1, %c0_i32_0 : i32
    scf.if %2 {
      %cst_12 = arith.constant 0xFF800000 : f32
      %34 = vector.broadcast %cst_12 : f32 to vector<8x128xf32>
      %c0_13 = arith.constant 0 : index
      %c0_14 = arith.constant 0 : index
      %35 = vector.load %arg5[%c0_13, %c0_14] : memref<8x128xf32, #tpu.memory_space<vmem>>, vector<8x128xf32>
      tpu.vector_store %arg5[%c0_13, %c0_14], %34 {strides = array<i32>} : memref<8x128xf32, #tpu.memory_space<vmem>>, vector<8x128xf32>,
    } else {
    }
    %c8_i32 = arith.constant 8 : i32
    %3 = arith.muli %arg1, %c8_i32 : i32
    %c0_i32_1 = arith.constant 0 : i32
    %4 = arith.cmpi eq, %arg1, %c0_i32_1 : i32
    %5 = tpu.iota {dimensions = array<i32: 1>} : vector<1x8x1xi32>
    %c0_i32_2 = arith.constant 0 : i32
    %c8_i32_3 = arith.constant 8 : i32
    %6 = arith.muli %c0_i32_2, %c8_i32_3 : i32
    %7 = tpu.assume_multiple %6, 8 : i32
    %8 = arith.index_cast %7 : i32 to index
    %c0 = arith.constant 0 : index
    %9 = vector.load %arg2[%8, %c0] : memref<8x1xi32, #tpu.memory_space<vmem>>, vector<8x1xi32>
    %10 = vector.shape_cast %9 : vector<8x1xi32> to vector<8x1x1xi32>
    %c0_i32_4 = arith.constant 0 : i32
    %c8_i32_5 = arith.constant 8 : i32
    %11 = arith.muli %c0_i32_4, %c8_i32_5 : i32
    %12 = tpu.assume_multiple %11, 8 : i32
    %13 = arith.index_cast %7 : i32 to index
    %14 = arith.index_cast %12 : i32 to index
    %c0_6 = arith.constant 0 : index
    %15 = vector.load %arg3[%13, %14, %c0_6] : memref<8x8x128xf32, #tpu.memory_space<vmem>>, vector<8x8x128xf32>
    %16 = arith.addi %3, %12 : i32
    %17 = vector.broadcast %16 : i32 to vector<1x8x1xi32>
    %18 = arith.addi %17, %5 : vector<1x8x1xi32>
    %19 = vector.broadcast %18 : vector<1x8x1xi32> to vector<8x8x1xi32>
    %20 = vector.broadcast %10 : vector<8x1x1xi32> to vector<8x8x1xi32>
    %21 = arith.cmpi slt, %19, %20 : vector<8x8x1xi32>
    %cst = arith.constant 0xFF800000 : f32
    %22 = vector.shape_cast %21 : vector<8x8x1xi1> to vector<8x8x1xi1>
    %23 = vector.broadcast %22 : vector<8x8x1xi1> to vector<8x8x128xi1>
    %24 = vector.broadcast %cst : f32 to vector<8x8x128xf32>
    %25 = arith.select %23, %15, %24 : vector<8x8x128xi1>, vector<8x8x128xf32>
    %26 = arith.index_cast %7 : i32 to index
    %c0_7 = arith.constant 0 : index
    %27 = vector.load %arg5[%26, %c0_7] : memref<8x128xf32, #tpu.memory_space<vmem>>, vector<8x128xf32>
    %cst_8 = arith.constant dense<0xFF800000> : vector<8x128xf32>
    %28 = vector.multi_reduction <maximumf>, %25, %cst_8 [1] : vector<8x8x128xf32> to vector<8x128xf32>
    %29 = arith.maximumf %27, %28 : vector<8x128xf32>
    %30 = arith.index_cast %7 : i32 to index
    %c0_9 = arith.constant 0 : index
    %31 = vector.load %arg5[%30, %c0_9] : memref<8x128xf32, #tpu.memory_space<vmem>>, vector<8x128xf32>
    tpu.vector_store %arg5[%30, %c0_9], %29 {strides = array<i32>} : memref<8x128xf32, #tpu.memory_space<vmem>>, vector<8x128xf32>,
    %c1_i32 = arith.constant 1 : i32
    %32 = arith.extui %4 : i1 to i32
    %c0_i32_10 = arith.constant 0 : i32
    %33 = arith.cmpi ne, %32, %c0_i32_10 : i32
    scf.if %33 {
      %c0_i32_12 = arith.constant 0 : i32
      %34 = vector.broadcast %c0_i32_12 : i32 to vector<8x1xi32>
      %35 = arith.cmpi sgt, %9, %34 : vector<8x1xi32>
      %36 = arith.index_cast %7 : i32 to index
      %c0_13 = arith.constant 0 : index
      %37 = vector.load %arg5[%36, %c0_13] : memref<8x128xf32, #tpu.memory_space<vmem>>, vector<8x128xf32>
      %cst_14 = arith.constant 0.000000e+00 : f32
      %38 = vector.shape_cast %35 : vector<8x1xi1> to vector<8x1xi1>
      %39 = vector.broadcast %38 : vector<8x1xi1> to vector<8x128xi1>
      %40 = vector.broadcast %cst_14 : f32 to vector<8x128xf32>
      %41 = arith.select %39, %37, %40 : vector<8x128xi1>, vector<8x128xf32>
      %42 = arith.index_cast %7 : i32 to index
      %c0_15 = arith.constant 0 : index
      %43 = vector.load %arg4[%42, %c0_15] : memref<8x128xf32, #tpu.memory_space<vmem>>, vector<8x128xf32>
      tpu.vector_store %arg4[%42, %c0_15], %41 {strides = array<i32>} : memref<8x128xf32, #tpu.memory_space<vmem>>, vector<8x128xf32>,
    } else {
    }
    %c1_i32_11 = arith.constant 1 : i32
    return
  }
  func.func @transform_0(%arg0: i32, %arg1: i32) -> (i32, i32) {
    %c0_i32 = arith.constant 0 : i32
    %c0_i32_0 = arith.constant 0 : i32
    return %arg0, %c0_i32 : i32, i32
  }
  func.func @transform_1(%arg0: i32, %arg1: i32) -> (i32, i32, i32) {
    %c0_i32 = arith.constant 0 : i32
    %c0_i32_0 = arith.constant 0 : i32
    return %arg0, %arg1, %c0_i32 : i32, i32, i32
  }
  func.func @transform_2(%arg0: i32, %arg1: i32) -> (i32, i32) {
    %c0_i32 = arith.constant 0 : i32
    %c0_i32_0 = arith.constant 0 : i32
    return %arg0, %c0_i32 : i32, i32
  }
}

</mosaic_0001>

<bundles_post_ra>
// kernel: tpu_custom_call.1
= control target key start
LH: loop header
LB: loop body
LE: loop exit
PB: predicated region body
PF: predicated region fallthrough
CT: control target
= control target key end

     0   :  { %7 = vsyncpa [#allocation4], 0  ;;  %s378_s0 = inlined_call_operand.vmem [shape: s32[8,1], index: 0, kind: input, shape index: {}]   ;;  %s379_s1 = inlined_call_operand.hbm [shape: f32[4,8,128], index: 1, kind: input, shape index: {}]   ;;  %s380_s2 = inlined_call_operand.hbm [shape: f32[4,128], index: 2, kind: output, shape index: {}]  }
   0x1   :  { %8 = vsyncpa [#allocation5], 0 }
   0x2   :  { %15 = vsyncadd [#allocation4], 512  ;;  %s344_s9 = smov [#allocation3]  }
   0x3   :  { %s16_s10 = sshll.u32 %s344_s9, 4  ;;  %s17_s10 = int_to_ptr.vmem [resolvable:$true] %s16_s10 }
   0x4   :  { %s308_s11 = scalar_lea.vmem %s17_s10, 512  ;;  %s312_s12 = scalar_lea.vmem %s17_s10, 1024 }
   0x5   :  { %p309_p0 = scmp.ne.s32.totalorder %s17_s10, %s308_s11  ;;  %p313_p1 = scmp.lt.s32.totalorder %s17_s10, %s17_s10 }
   0x6   :  { %p314_p2 = scmp.lt.s32.totalorder %s312_s12, %s308_s11 }
   0x8   :  { %p315_p3 = por %p314_p2, %p313_p1 }
   0xa   :  { %p316_p4 = pnand %p315_p3, %p309_p0 }
   0xc   :  { %319 = shalt.err (!%p316_p4)
}
   0xd   :  { %s345_s13 = smov 128   ;;  %s346_s14 = smov 8  }
   0xe   :  { %22 = dma.hbm_to_vmem [thread:$0]  %s379_s1, 512, %s17_s10, [#allocation4], %s345_s13, %s345_s13, %s346_s14  }
   0xf   :  { %340 = dma.done.wait [#allocation4], 1024  }
  0x10   :  { %341 = vsyncadd [#allocation4], 4294966272  ;;  %v32_v0 = vlaneseq  ;;  %v347_v1 = vmov 0   ;;  %v348_v2 = vmov 1966171168   ;;  %v34_v7 = vld [vmem:[%s378_s0] sm:$0xff] }
  0x11   :  { %297 = vset.pattern.permute.xlu0 %v347_v1  ;;  %v37_v3 = vunpack.c.l.s4 %v348_v2  ;;  %298 = vset.pattern.permute.xlu1 %v347_v1  ;;  %v35_v10 = vcombine.high %v34_v7, %v34_v7  ;;  %vm263_vm8 = vcmp.gt.s32.totalorder %v34_v7, 0  ;;  %v87_v39 = vld [vmem:[#allocation3] sm:$0xff]  ;;  %v89_v41 = vld [vmem:[#allocation3 + $0x10] sm:$0xff]  ;;  %v88_v45 = vld [vmem:[#allocation3 + $0x8] sm:$0xff]  ;;  %vm243_vm15 = vcmask 1041409  }
  0x12   :  { %v33_v4 = vshrl.u32 %v32_v0, 7  ;;  %v265_v38 = vsel %vm263_vm8, 1, %v347_v1  ;;  %v90_v50 = vld [vmem:[#allocation3 + $0x18] sm:$0xff]  ;;  %v91_v62 = vld [vmem:[#allocation3 + $0x20] sm:$0xff] }
  0x13   :  { %v38_v5 = vunpack.c.0.s8 %v37_v3  ;;  %v92_v3 = vld [vmem:[#allocation3 + $0x28] sm:$0xff] }
  0x14   :  { %v100_v9 = vsub.s32 0, %v33_v4 }
  0x15   :  { %v41_v6 = vsub.s32 %v38_v5, %v33_v4 }
  0x17   :  { %v42_v8 = vrot.slane %v34_v7, %v41_v6  ;;  %v49_v13 = vrot.slane %v35_v10, %v41_v6 }
  0x19   :  { %v58_v11 = vrot.slane %v42_v8, %v41_v6  ;;  %v50_v12 = vcombine.high %v42_v8, %v42_v8  ;;  %v65_v17 = vrot.slane %v49_v13, %v41_v6  ;;  %v51_v18 = vcombine.high %v49_v13, %v49_v13 }
  0x1b   :  { %v101_v14 = vrot.slane %v58_v11, %v100_v9  ;;  %v80_v15 = vcombine.high %v58_v11, %v58_v11  ;;  %v72_v16 = vrot.slane %v50_v12, %v41_v6  ;;  %v117_v23 = vrot.slane %v65_v17, %v100_v9 }
  0x1c   :  { %v79_v24 = vrot.slane %v51_v18, %v41_v6  ;;  %v81_v25 = vcombine.high %v65_v17, %v65_v17  ;;  %v94_v17 = vld [vmem:[#allocation3 + $0x38] sm:$0xff] }
  0x1d   :  { %vm130_vm0 = vcmp.lt.s32.totalorder %v33_v4, %v101_v14  ;;  %v109_v19 = vrot.slane %v80_v15, %v100_v9  ;;  %v105_v20 = vrot.slane %v72_v16, %v100_v9  ;;  %v82_v21 = vcombine.high %v72_v16, %v72_v16 }
  0x1e   :  { %v138_v22 = vsel %vm130_vm0, 1, %v347_v1  ;;  %v121_v29 = vrot.slane %v79_v24, %v100_v9  ;;  %vm134_vm4 = vcmp.lt.s32.totalorder %v33_v4, %v117_v23  ;;  %v125_v30 = vrot.slane %v81_v25, %v100_v9 }
  0x1f   :  { %147 = vperm.xlu0 %297, %v138_v22   ;;  %vm132_vm1 = vcmp.lt.s32.totalorder %v33_v4, %v109_v19  ;;  %vm131_vm2 = vcmp.lt.s32.totalorder %v33_v4, %v105_v20  ;;  %v113_v26 = vrot.slane %v82_v21, %v100_v9  ;;  %v83_v31 = vcombine.high %v79_v24, %v79_v24 }
  0x20   :  { %v140_v27 = vsel %vm132_vm1, 1, %v347_v1  ;;  %v139_v28 = vsel %vm131_vm2, 1, %v347_v1  ;;  %vm135_vm5 = vcmp.lt.s32.totalorder %v33_v4, %v121_v29  ;;  %v142_v34 = vsel %vm134_vm4, 1, %v347_v1 }
  0x21   :  { %153 = vperm.xlu1 %298, %v140_v27   ;;  %vm133_vm3 = vcmp.lt.s32.totalorder %v33_v4, %v113_v26  ;;  %v129_v33 = vrot.slane %v83_v31, %v100_v9  ;;  %vm136_vm6 = vcmp.lt.s32.totalorder %v33_v4, %v125_v30  ;;  %v143_v35 = vsel %vm135_vm5, 1, %v347_v1  ;;  %v93_v9 = vld [vmem:[#allocation3 + $0x30] sm:$0xff] }
  0x22   :  { %v141_v32 = vsel %vm133_vm3, 1, %v347_v1  ;;  %v144_v36 = vsel %vm136_vm6, 1, %v347_v1  ;;  %vm245_vm1 = vcmask 1042434   ;;  %vm247_vm3 = vcmask 1043459  }
  0x23   :  { %150 = vperm.xlu0 %297, %v139_v28   ;;  %vm137_vm7 = vcmp.lt.s32.totalorder %v33_v4, %v129_v33  ;;  %vm249_vm4 = vcmask 1044484   ;;  %vm251_vm5 = vcmask 1045509   ;;  %vm253_vm6 = vcmask 1046534  }
  0x24   :  { %v145_v37 = vsel %vm137_vm7, 1, %v347_v1  ;;  %vm255_vm7 = vcmask 1047559  }
  0x25   :  { %156 = vperm.xlu1 %298, %v141_v32  }
  0x27   :  { %159 = vperm.xlu0 %297, %v142_v34  }
  0x29   :  { %162 = vperm.xlu1 %298, %v143_v35  }
  0x2b   :  { %165 = vperm.xlu0 %297, %v144_v36  }
  0x2d   :  { %168 = vperm.xlu1 %298, %v145_v37  }
  0x2f   :  { %267 = vperm.xlu0 %297, %v265_v38  }
  0x9a   :  { %v148_v40 = vpop.permute.xlu0 %147 }
  0x9b   :  { %vm170_vm9 = vcmp.eq.s32.totalorder %v148_v40, 1 }
  0x9c   :  { %v178_v42 = vsel %vm170_vm9, %v87_v39, -inf  ;;  %v154_v43 = vpop.permute.xlu1 %153 }
  0x9d   :  { %v187_v44 = vrot.slane %v178_v42, 4  ;;  %vm172_vm10 = vcmp.eq.s32.totalorder %v154_v43, 1 }
  0x9e   :  { %v180_v46 = vsel %vm172_vm10, %v89_v41, -inf  ;;  %v151_v47 = vpop.permute.xlu0 %150 }
  0x9f   :  { %v188_v48 = vmax.f32 %v178_v42, %v187_v44  ;;  %v199_v49 = vrot.slane %v180_v46, 4  ;;  %vm171_vm11 = vcmp.eq.s32.totalorder %v151_v47, 1 }
  0xa0   :  { %v179_v51 = vsel %vm171_vm11, %v88_v45, -inf  ;;  %v157_v52 = vpop.permute.xlu1 %156 }
  0xa1   :  { %v189_v53 = vrot.slane %v188_v48, 2  ;;  %v200_v54 = vmax.f32 %v180_v46, %v199_v49  ;;  %v193_v55 = vrot.slane %v179_v51, 4  ;;  %vm173_vm12 = vcmp.eq.s32.totalorder %v157_v52, 1 }
  0xa2   :  { %v181_v56 = vsel %vm173_vm12, %v90_v50, -inf  ;;  %v160_v57 = vpop.permute.xlu0 %159 }
  0xa3   :  { %v190_v58 = vmax.f32 %v188_v48, %v189_v53  ;;  %v201_v59 = vrot.slane %v200_v54, 2  ;;  %v194_v60 = vmax.f32 %v179_v51, %v193_v55  ;;  %v205_v61 = vrot.slane %v181_v56, 4 }
  0xa4   :  { %vm174_vm13 = vcmp.eq.s32.totalorder %v160_v57, 1  ;;  %v163_v63 = vpop.permute.xlu1 %162 }
  0xa5   :  { %v202_v0 = vmax.f32 %v200_v54, %v201_v59  ;;  %v195_v1 = vrot.slane %v194_v60, 2  ;;  %v206_v2 = vmax.f32 %v181_v56, %v205_v61  ;;  %v191_v4 = vrot.slane %v190_v58, 1 }
  0xa6   :  { %v182_v5 = vsel %vm174_vm13, %v91_v62, -inf  ;;  %vm175_vm14 = vcmp.eq.s32.totalorder %v163_v63, 1  ;;  %v166_v6 = vpop.permute.xlu0 %165 }
  0xa7   :  { %v196_v7 = vmax.f32 %v194_v60, %v195_v1  ;;  %v207_v8 = vrot.slane %v206_v2, 2  ;;  %v203_v10 = vrot.slane %v202_v0, 1  ;;  %v211_v11 = vrot.slane %v182_v5, 4 }
  0xa8   :  { %v183_v12 = vsel %vm175_vm14, %v92_v3, -inf  ;;  %vm176_vm0 = vcmp.eq.s32.totalorder %v166_v6, 1  ;;  %v169_v13 = vpop.permute.xlu1 %168  ;;  %v192_v18 = vmax.f32 %v190_v58, %v191_v4 }
  0xa9   :  { %v197_v14 = vrot.slane %v196_v7, 1  ;;  %v208_v15 = vmax.f32 %v206_v2, %v207_v8  ;;  %v217_v16 = vrot.slane %v183_v12, 4  ;;  %v212_v19 = vmax.f32 %v182_v5, %v211_v11 }
  0xaa   :  { %v184_v20 = vsel %vm176_vm0, %v93_v9, -inf  ;;  %vm177_vm2 = vcmp.eq.s32.totalorder %v169_v13, 1  ;;  %v204_v25 = vmax.f32 %v202_v0, %v203_v10  ;;  %v268_v51 = vpop.permute.xlu0 %267 }
  0xab   :  { %v198_v21 = vmax.f32 %v196_v7, %v197_v14  ;;  %v209_v22 = vrot.slane %v208_v15, 1  ;;  %v218_v23 = vmax.f32 %v183_v12, %v217_v16  ;;  %v223_v24 = vrot.slane %v184_v20, 4 }
  0xac   :  { %v213_v26 = vrot.slane %v212_v19, 2  ;;  %v185_v27 = vsel %vm177_vm2, %v94_v17, -inf  ;;  %vm269_vm8 = vcmp.eq.s32.totalorder %v268_v51, 1 }
  0xad   :  { %v244_v28 = vsel %vm243_vm15, %v198_v21, %v192_v18  ;;  %v210_v29 = vmax.f32 %v208_v15, %v209_v22  ;;  %v219_v30 = vrot.slane %v218_v23, 2  ;;  %v224_v31 = vmax.f32 %v184_v20, %v223_v24 }
  0xae   :  { %v214_v32 = vmax.f32 %v212_v19, %v213_v26  ;;  %v229_v33 = vrot.slane %v185_v27, 4  ;;  %v246_v34 = vsel %vm245_vm1, %v204_v25, %v244_v28 }
  0xaf   :  { %v220_v35 = vmax.f32 %v218_v23, %v219_v30  ;;  %v225_v36 = vrot.slane %v224_v31, 2  ;;  %v248_v41 = vsel %vm247_vm3, %v210_v29, %v246_v34 }
  0xb0   :  { %v215_v37 = vrot.slane %v214_v32, 1  ;;  %v230_v38 = vmax.f32 %v185_v27, %v229_v33 }
  0xb1   :  { %v221_v39 = vrot.slane %v220_v35, 1  ;;  %v226_v40 = vmax.f32 %v224_v31, %v225_v36 }
  0xb2   :  { %v216_v42 = vmax.f32 %v214_v32, %v215_v37  ;;  %v231_v43 = vrot.slane %v230_v38, 2 }
  0xb3   :  { %v222_v44 = vmax.f32 %v220_v35, %v221_v39  ;;  %v227_v45 = vrot.slane %v226_v40, 1 }
  0xb4   :  { %v232_v46 = vmax.f32 %v230_v38, %v231_v43  ;;  %v250_v47 = vsel %vm249_vm4, %v216_v42, %v248_v41 }
  0xb5   :  { %v228_v48 = vmax.f32 %v226_v40, %v227_v45  ;;  %v252_v49 = vsel %vm251_vm5, %v222_v44, %v250_v47 }
  0xb6   :  { %v233_v50 = vrot.slane %v232_v46, 1 }
  0xb7   :  { %v254_v52 = vsel %vm253_vm6, %v228_v48, %v252_v49 }
  0xb8   :  { %v234_v53 = vmax.f32 %v232_v46, %v233_v50 }
  0xba   :  { %v256_v54 = vsel %vm255_vm7, %v234_v53, %v254_v52 }
  0xbb   :  { %v270_v55 = vsel %vm269_vm8, %v256_v54, 0.0 }
  0xbc   :  { %271 = vst [vmem:[#allocation6] sm:$0xff] %v270_v55 }
  0xbd   :  { %276 = vsyncadd [#allocation5], 64  ;;  %s349_s0 = smov [#allocation6]  }
  0xbe   :  { %s277_s1 = sshll.u32 %s349_s0, 4  ;;  %s278_s1 = int_to_ptr.vmem [resolvable:$true] %s277_s1 }
  0xbf   :  { %s320_s19 = scalar_lea.vmem %s278_s1, 64  ;;  %s324_s20 = scalar_lea.vmem %s278_s1, 128 }
  0xc0   :  { %p321_p5 = scmp.ne.s32.totalorder %s278_s1, %s320_s19  ;;  %p325_p6 = scmp.lt.s32.totalorder %s278_s1, %s278_s1 }
  0xc1   :  { %p326_p7 = scmp.lt.s32.totalorder %s324_s20, %s320_s19 }
  0xc3   :  { %p327_p8 = por %p326_p7, %p325_p6 }
  0xc5   :  { %p328_p9 = pnand %p327_p8, %p321_p5 }
  0xc7   :  { %331 = shalt.err (!%p328_p9)
}
  0xc8   :  { %s350_s21 = smov 64   ;;  %s351_s22 = smov 4  }
  0xc9   :  { %283 = dma.vmem_to_hbm [thread:$0]  %s278_s1, 64, %s380_s2, [#allocation5], %s350_s21, %s350_s21, %s351_s22  }
  0xca   :  { %342 = dma.done.wait [#allocation5], 128  }
  0xcb   :  { %343 = vsyncadd [#allocation5], 4294967168 }
  0xcc   :  { %287 = vsyncpa [#allocation4], 1 }
  0xcd   :  { %288 = vsyncpa [#allocation5], 1 }

</bundles_post_ra>
